<compile_context>
chip_gen: v6e
topology: v6e:2x2x1
jax: 0.10.0
libtpu: 0.0.40
codegen_flags: <defaults>
</compile_context>

<pallas_src>
import jax
import jax.numpy as jnp
from jax.experimental import pallas as pl
from jax.experimental.pallas import tpu as pltpu


def _weighted_quotient_kernel(x_ref, mask_ref, w_ref, wot_ref, ts_ref,
                              o_ref, acc_ref):
    # x_ref   : (TB, C, W) input tile (native dtype), H==0 plane only
    # mask_ref: (1, W)  f32 0/1 mask selecting columns [0,10) U [90, W)
    # w_ref   : (C, 1)  f32 weights
    # wot_ref : (C, 1)  f32 weights * off_target
    # ts_ref  : (C, 1)  f32 scale * target
    # o_ref   : (1, 1)  f32 output
    # acc_ref : (C, W)  f32 scratch accumulator (unmasked per-channel sums)
    b = pl.program_id(0)

    @pl.when(b == 0)
    def _init():
        acc_ref[...] = jnp.zeros_like(acc_ref)

    # Steady state: only cheap VPU adds (batch-axis reduce + accumulate).
    acc_ref[...] += jnp.sum(x_ref[...].astype(jnp.float32), axis=0)   # (C, W)

    @pl.when(b == pl.num_programs(0) - 1)
    def _finalize():
        # Mask + lane reduce once, then the tiny weighted quotient.
        s = jnp.sum(acc_ref[...] * mask_ref[...], axis=1, keepdims=True)  # (C,1)
        y = s * w_ref[...]                        # (C, 1)  == s * weights
        num = jnp.sum(s * wot_ref[...])           # scalar  == y @ off_target
        # PyTorch forward parses left-assoc: ((y @ off_target) / y) @ target
        o_ref[...] = jnp.sum((num / y) * ts_ref[...], keepdims=True)


@jax.jit
def weighted_quotient(x, weights, target, off_target, scale=1.0):
    """x: [B, C, H, W] NCHW; weights/target/off_target: [C]; returns scalar."""
    B, C, H, W = x.shape

    # Free reshape of a contiguous NCHW array: columns [0, W) of the merged
    # last dim are exactly the h == 0 plane; selected by the BlockSpec.
    # (Requires W to be a multiple of 128 when H > 1, per the lane-tiling rule.)
    x3 = x.reshape(B, C, H * W)

    # (1, W) 0/1 mask implementing the [:10] and [90:] column selection.
    col = jnp.arange(W)
    mask = ((col < 10) | (col >= 90)).astype(jnp.float32).reshape(1, W)

    w32 = weights.astype(jnp.float32)
    t32 = target.astype(jnp.float32)
    ot32 = off_target.astype(jnp.float32)
    w_col = w32.reshape(C, 1)
    wot = (w32 * ot32).reshape(C, 1)             # weights * off_target
    ts = (jnp.float32(scale) * t32).reshape(C, 1)  # scale folded into target

    # Batch-tile size: largest divisor of B keeping the x block under ~4 MiB
    # (only x is double-buffered at size; safe on v5e's 16 MiB scoped VMEM
    # default and on v6e/v7x).
    itemsize = x.dtype.itemsize
    budget = 4 * 1024 * 1024
    per_b = C * W * itemsize
    tb = 1
    for cand in range(1, B + 1):
        if B % cand == 0 and cand * per_b <= budget:
            tb = cand
    grid = (B // tb,)

    grid_spec = pltpu.PrefetchScalarGridSpec(
        num_scalar_prefetch=0,
        grid=grid,
        in_specs=[
            pl.BlockSpec((tb, C, W), lambda b: (b, 0, 0)),   # H==0 plane only
            pl.BlockSpec((1, W), lambda b: (0, 0)),
            pl.BlockSpec((C, 1), lambda b: (0, 0)),
            pl.BlockSpec((C, 1), lambda b: (0, 0)),
            pl.BlockSpec((C, 1), lambda b: (0, 0)),
        ],
        out_specs=pl.BlockSpec((1, 1), lambda b: (0, 0)),
        scratch_shapes=[pltpu.VMEM((C, W), jnp.float32)],
    )

    out = pl.pallas_call(
        _weighted_quotient_kernel,
        out_shape=jax.ShapeDtypeStruct((1, 1), jnp.float32),
        grid_spec=grid_spec,
        compiler_params=pltpu.CompilerParams(
            dimension_semantics=("arbitrary",),   # B axis is a reduction
        ),
        cost_estimate=pl.CostEstimate(
            flops=2 * B * C * W + 4 * C * W,
            transcendentals=0,
            bytes_accessed=B * C * W * itemsize + (3 * C + W + 1) * 4,
        ),
        # TODO(synk): on v7x the B stream could additionally be split across
        # the 2 TensorCores with a leading "parallel" axis and per-core
        # partial sums; kept single-core here for portability.
    )(x3, mask, w_col, wot, ts)
    return out[0, 0]


if __name__ == "__main__":
    key = jax.random.PRNGKey(0)
    kx, kw = jax.random.split(key, 2)

    # Small shapes; last dim must be >= 91 for the [:10] / [90:] slices.
    B, C, H, W = 2, 8, 4, 128
    x = jax.random.normal(kx, (B, C, H, W), jnp.float32)

    # Deterministic parameters (module __init__: target, weights, scale).
    target = jnp.array([1., 0., 1., 0., 1., 0., 1., 0.], jnp.float32)   # [C]
    off_target = 1.0 - target
    weights = jax.random.uniform(kw, (C,), jnp.float32, 0.5, 1.5)
    scale = 1.0

    out = weighted_quotient(x, weights, target, off_target, scale)
    out = jax.block_until_ready(out)

    # Pure-JAX reference reproducing the PyTorch forward *exactly*, including
    # the left-to-right parse of `x @ off_target / x @ target`.
    xs = x[:, :, 0, :]
    s = jnp.sum(xs[:, :, :10], (0, 2)) + jnp.sum(xs[:, :, 90:], (0, 2))
    y = s * weights
    ref = scale * (((y @ off_target) / y) @ target)

    assert jnp.allclose(out, ref, rtol=1e-4, atol=1e-4), (out, ref)
    print("KERNEL_OK")
</pallas_src>

<mosaic_0001>
module attributes {stable_mosaic.version = 11 : i64} {
  func.func @_weighted_quotient_kernel(%arg0: i32, %arg1: memref<2x8x128xf32, #tpu.memory_space<vmem>>, %arg2: memref<1x128xf32, #tpu.memory_space<vmem>>, %arg3: memref<8x1xf32, #tpu.memory_space<vmem>>, %arg4: memref<8x1xf32, #tpu.memory_space<vmem>>, %arg5: memref<8x1xf32, #tpu.memory_space<vmem>>, %arg6: memref<1x1xf32, #tpu.memory_space<vmem>>, %arg7: memref<8x128xf32, #tpu.memory_space<vmem>>) attributes {dimension_semantics = [#tpu.dimension_semantics<arbitrary>], iteration_bounds = array<i64: 1>, scalar_prefetch = 0 : i64, scratch_operands = 1 : i64, tpu.core_type = #tpu.core_type<tc>, window_params = [{transform_indices = @transform_0, window_bounds = array<i64: 2, 8, 128>}, {pipeline_mode = #tpu.pipeline_mode<synchronous>, transform_indices = @transform_1, window_bounds = array<i64: 1, 128>}, {pipeline_mode = #tpu.pipeline_mode<synchronous>, transform_indices = @transform_2, window_bounds = array<i64: 8, 1>}, {pipeline_mode = #tpu.pipeline_mode<synchronous>, transform_indices = @transform_3, window_bounds = array<i64: 8, 1>}, {pipeline_mode = #tpu.pipeline_mode<synchronous>, transform_indices = @transform_4, window_bounds = array<i64: 8, 1>}, {pipeline_mode = #tpu.pipeline_mode<synchronous>, transform_indices = @transform_5, window_bounds = array<i64: 1, 1>}]} {
    %c0_i32 = arith.constant 0 : i32
    %0 = arith.cmpi eq, %arg0, %c0_i32 : i32
    %1 = arith.extui %0 : i1 to i32
    %c0_i32_0 = arith.constant 0 : i32
    %2 = arith.cmpi ne, %1, %c0_i32_0 : i32
    scf.if %2 {
      %cst_9 = arith.constant 0.000000e+00 : f32
      %11 = vector.broadcast %cst_9 : f32 to vector<8x128xf32>
      %c0_10 = arith.constant 0 : index
      %c0_11 = arith.constant 0 : index
      %12 = vector.load %arg7[%c0_10, %c0_11] : memref<8x128xf32, #tpu.memory_space<vmem>>, vector<8x128xf32>
      tpu.vector_store %arg7[%c0_10, %c0_11], %11 {strides = array<i32>} : memref<8x128xf32, #tpu.memory_space<vmem>>, vector<8x128xf32>,
    } else {
    }
    %c0 = arith.constant 0 : index
    %c0_1 = arith.constant 0 : index
    %3 = vector.load %arg7[%c0, %c0_1] : memref<8x128xf32, #tpu.memory_space<vmem>>, vector<8x128xf32>
    %c0_2 = arith.constant 0 : index
    %c0_3 = arith.constant 0 : index
    %c0_4 = arith.constant 0 : index
    %4 = vector.load %arg1[%c0_2, %c0_3, %c0_4] : memref<2x8x128xf32, #tpu.memory_space<vmem>>, vector<2x8x128xf32>
    %cst = arith.constant dense<0.000000e+00> : vector<8x128xf32>
    %5 = vector.multi_reduction <add>, %4, %cst [0] : vector<2x8x128xf32> to vector<8x128xf32>
    %6 = arith.addf %3, %5 : vector<8x128xf32>
    %c0_5 = arith.constant 0 : index
    %c0_6 = arith.constant 0 : index
    %7 = vector.load %arg7[%c0_5, %c0_6] : memref<8x128xf32, #tpu.memory_space<vmem>>, vector<8x128xf32>
    tpu.vector_store %arg7[%c0_5, %c0_6], %6 {strides = array<i32>} : memref<8x128xf32, #tpu.memory_space<vmem>>, vector<8x128xf32>,
    %c0_i32_7 = arith.constant 0 : i32
    %8 = arith.cmpi eq, %arg0, %c0_i32_7 : i32
    %9 = arith.extui %8 : i1 to i32
    %c0_i32_8 = arith.constant 0 : i32
    %10 = arith.cmpi ne, %9, %c0_i32_8 : i32
    scf.if %10 {
      %c0_9 = arith.constant 0 : index
      %c0_10 = arith.constant 0 : index
      %11 = vector.load %arg7[%c0_9, %c0_10] : memref<8x128xf32, #tpu.memory_space<vmem>>, vector<8x128xf32>
      %c0_11 = arith.constant 0 : index
      %c0_12 = arith.constant 0 : index
      %12 = vector.load %arg2[%c0_11, %c0_12] : memref<1x128xf32, #tpu.memory_space<vmem>>, vector<1x128xf32>
      %13 = vector.broadcast %12 : vector<1x128xf32> to vector<8x128xf32>
      %14 = arith.mulf %11, %13 : vector<8x128xf32>
      %cst_13 = arith.constant dense<0.000000e+00> : vector<8xf32>
      %15 = vector.multi_reduction <add>, %14, %cst_13 [1] : vector<8x128xf32> to vector<8xf32>
      %16 = vector.shape_cast %15 : vector<8xf32> to vector<8x1xf32>
      %c0_14 = arith.constant 0 : index
      %c0_15 = arith.constant 0 : index
      %17 = vector.load %arg3[%c0_14, %c0_15] : memref<8x1xf32, #tpu.memory_space<vmem>>, vector<8x1xf32>
      %18 = arith.mulf %16, %17 : vector<8x1xf32>
      %c0_16 = arith.constant 0 : index
      %c0_17 = arith.constant 0 : index
      %19 = vector.load %arg4[%c0_16, %c0_17] : memref<8x1xf32, #tpu.memory_space<vmem>>, vector<8x1xf32>
      %20 = arith.mulf %16, %19 : vector<8x1xf32>
      %21 = vector.shape_cast %20 : vector<8x1xf32> to vector<1x8x1xf32>
      %cst_18 = arith.constant dense<0.000000e+00> : vector<1xf32>
      %22 = vector.multi_reduction <add>, %21, %cst_18 [1, 2] : vector<1x8x1xf32> to vector<1xf32>
      %23 = vector.shape_cast %22 : vector<1xf32> to vector<1x1x1xf32>
      %24 = vector.extract %23[0, 0, 0] : f32 from vector<1x1x1xf32>
      %25 = vector.broadcast %24 : f32 to vector<8x1xf32>
      %26 = arith.divf %25, %18 : vector<8x1xf32>
      %c0_19 = arith.constant 0 : index
      %c0_20 = arith.constant 0 : index
      %27 = vector.load %arg5[%c0_19, %c0_20] : memref<8x1xf32, #tpu.memory_space<vmem>>, vector<8x1xf32>
      %28 = arith.mulf %26, %27 : vector<8x1xf32>
      %29 = vector.shape_cast %28 : vector<8x1xf32> to vector<1x8x1xf32>
      %cst_21 = arith.constant dense<0.000000e+00> : vector<1xf32>
      %30 = vector.multi_reduction <add>, %29, %cst_21 [1, 2] : vector<1x8x1xf32> to vector<1xf32>
      %31 = vector.shape_cast %30 : vector<1xf32> to vector<1x1x1xf32>
      %32 = vector.extract %31[0, 0, 0] : f32 from vector<1x1x1xf32>
      %33 = vector.broadcast %32 : f32 to vector<1x1xf32>
      %c0_22 = arith.constant 0 : index
      %c0_23 = arith.constant 0 : index
      %34 = vector.load %arg6[%c0_22, %c0_23] : memref<1x1xf32, #tpu.memory_space<vmem>>, vector<1x1xf32>
      tpu.vector_store %arg6[%c0_22, %c0_23], %33 {strides = array<i32>} : memref<1x1xf32, #tpu.memory_space<vmem>>, vector<1x1xf32>,
    } else {
    }
    return
  }
  func.func @transform_0(%arg0: i32) -> (i32, i32, i32) {
    %c0_i32 = arith.constant 0 : i32
    %c0_i32_0 = arith.constant 0 : i32
    %c0_i32_1 = arith.constant 0 : i32
    return %arg0, %c0_i32, %c0_i32_0 : i32, i32, i32
  }
  func.func @transform_1(%arg0: i32) -> (i32, i32) {
    %c0_i32 = arith.constant 0 : i32
    %c0_i32_0 = arith.constant 0 : i32
    %c0_i32_1 = arith.constant 0 : i32
    return %c0_i32, %c0_i32_0 : i32, i32
  }
  func.func @transform_2(%arg0: i32) -> (i32, i32) {
    %c0_i32 = arith.constant 0 : i32
    %c0_i32_0 = arith.constant 0 : i32
    %c0_i32_1 = arith.constant 0 : i32
    return %c0_i32, %c0_i32_0 : i32, i32
  }
  func.func @transform_3(%arg0: i32) -> (i32, i32) {
    %c0_i32 = arith.constant 0 : i32
    %c0_i32_0 = arith.constant 0 : i32
    %c0_i32_1 = arith.constant 0 : i32
    return %c0_i32, %c0_i32_0 : i32, i32
  }
  func.func @transform_4(%arg0: i32) -> (i32, i32) {
    %c0_i32 = arith.constant 0 : i32
    %c0_i32_0 = arith.constant 0 : i32
    %c0_i32_1 = arith.constant 0 : i32
    return %c0_i32, %c0_i32_0 : i32, i32
  }
  func.func @transform_5(%arg0: i32) -> (i32, i32) {
    %c0_i32 = arith.constant 0 : i32
    %c0_i32_0 = arith.constant 0 : i32
    %c0_i32_1 = arith.constant 0 : i32
    return %c0_i32, %c0_i32_0 : i32, i32
  }
}

</mosaic_0001>

<bundles_post_ra>
// kernel: weighted_quotient.1
= control target key start
LH: loop header
LB: loop body
LE: loop exit
PB: predicated region body
PF: predicated region fallthrough
CT: control target
= control target key end

     0   :  { %s220_s0 = inlined_call_operand.vmem [shape: f32[2,8,512], index: 0, kind: input, shape index: {}]   ;;  %s221_s1 = inlined_call_operand.vmem [shape: f32[1,128], index: 1, kind: input, shape index: {}]   ;;  %s222_s2 = inlined_call_operand.vmem [shape: f32[8,1], index: 2, kind: input, shape index: {}]   ;;  %s223_s3 = inlined_call_operand.vmem [shape: f32[8,1], index: 3, kind: input, shape index: {}]   ;;  %s224_s4 = inlined_call_operand.vmem [shape: f32[8,1], index: 4, kind: input, shape index: {}]   ;;  %s225_s5 = inlined_call_operand.hbm [shape: f32[1,1], index: 5, kind: output, shape index: {}]  }
   0x1   :  { %v43_v0 = vld [vmem:[%s220_s0] sm:$0xff] }
   0x2   :  { %v45_v1 = vld [vmem:[%s220_s0 + $0x20] sm:$0xff] }
   0x3   :  { %v136_v2 = vld [vmem:[%s221_s1] ss:$0 sm:$0xff]  ;;  %v68_v3 = vadd.f32 %v45_v1, %v43_v0 }
   0x4   :  { %10 = vsyncpa [#allocation5], 0  ;;  %v87_v5 = vld [vmem:[%s223_s3] sm:$0xff]  ;;  %vm89_vm0 = vcmask 7168   ;;  %vm116_vm1 = vcmask 0  }
   0x5   :  { %v82_v4 = vmul.f32 %v136_v2, %v68_v3  ;;  %v85_v16 = vld [vmem:[%s222_s2] sm:$0xff]  ;;  %s166_s2 = smov [#allocation4]  }
   0x6   :  { %v103_v20 = vld [vmem:[%s224_s4] sm:$0xff]  ;;  %s124_s28 = sshll.u32 %s166_s2, 4  ;;  %s125_s28 = int_to_ptr.vmem [resolvable:$true] %s124_s28 }
   0x7   :  { %83 = vadd.xlane.f32.xlu0 %v82_v4  ;;  %s144_s4 = scalar_lea.vmem %s125_s28, 16  ;;  %s148_s30 = scalar_lea.vmem %s125_s28, 32 }
   0x8   :  { %p145_p0 = scmp.ne.s32.totalorder %s125_s28, %s144_s4  ;;  %p149_p1 = scmp.lt.s32.totalorder %s125_s28, %s125_s28 }
   0x9   :  { %p150_p2 = scmp.lt.s32.totalorder %s148_s30, %s144_s4 }
   0xb   :  { %p151_p3 = por %p150_p2, %p149_p1 }
   0xd   :  { %p152_p4 = pnand %p151_p3, %p145_p0 }
  0x90   :  { %v84_v6 = vpop.xlane.xlu0 %83 }
  0x91   :  { %v88_v7 = vmul.f32 %v87_v5, %v84_v6  ;;  %v86_v17 = vmul.f32 %v85_v16, %v84_v6 }
  0x93   :  { %v90_v8 = vsel %vm89_vm0, %v88_v7, 0.0  ;;  %142 = vrcp.f32 %v86_v17 }
  0x94   :  { %91 = vadd.xlane.f32.xlu0 %v90_v8 }
  0xa0   :  { %v143_v18 = vpop.eup %142 }
 0x11d   :  { %v92_v9 = vpop.xlane.xlu0 %91 }
 0x11e   :  { %v93_v10 = vrot.slane %v92_v9, 4 }
 0x120   :  { %v94_v11 = vadd.f32 %v93_v10, %v92_v9 }
 0x122   :  { %v95_v12 = vrot.slane %v94_v11, 2 }
 0x124   :  { %v96_v13 = vadd.f32 %v95_v12, %v94_v11 }
 0x126   :  { %v97_v14 = vrot.slane %v96_v13, 1 }
 0x128   :  { %v98_v15 = vadd.f32 %v97_v14, %v96_v13 }
 0x12a   :  { %137 = vpush %v98_v15 }
 0x15b   :  { %s138_s3 = spop %137 }
 0x15c   :  { %v100_v19 = vstv %s138_s3 }
 0x15d   :  { %v102_v21 = vmul.f32 %v143_v18, %v100_v19 }
 0x15f   :  { %v104_v22 = vmul.f32 %v103_v20, %v102_v21 }
 0x161   :  { %v105_v23 = vsel %vm89_vm0, %v104_v22, 0.0 }
 0x162   :  { %106 = vadd.xlane.f32.xlu1 %v105_v23 }
 0x1eb   :  { %v107_v24 = vpop.xlane.xlu1 %106 }
 0x1ec   :  { %v108_v25 = vrot.slane %v107_v24, 4 }
 0x1ee   :  { %v109_v26 = vadd.f32 %v108_v25, %v107_v24 }
 0x1f0   :  { %v110_v27 = vrot.slane %v109_v26, 2 }
 0x1f2   :  { %v111_v28 = vadd.f32 %v110_v27, %v109_v26 }
 0x1f4   :  { %v112_v29 = vrot.slane %v111_v28, 1 }
 0x1f6   :  { %v113_v30 = vadd.f32 %v112_v29, %v111_v28 }
 0x1f8   :  { %139 = vpush %v113_v30 }
 0x229   :  { %s140_s29 = spop %139 }
 0x22a   :  { %v115_v31 = vstv %s140_s29 }
 0x22b   :  { %117 = vst.msk [vmem:[#allocation4] sm:$0x1] %vm116_vm1, %v115_v31 }
 0x22c   :  { %155 = shalt.err (!%p152_p4)
}
 0x22d   :  { %127 = dma.vmem_to_hbm [thread:$0]  %s125_s28, 16, %s225_s5, [#allocation5]  }
 0x22e   :  { %164 = dma.done.wait [#allocation5], 16  }
 0x22f   :  { %165 = vsyncadd [#allocation5], 4294967280 }
 0x230   :  { %131 = vsyncpa [#allocation5], 1 }

</bundles_post_ra>
